<compile_context>
chip_gen: v7x
topology: tpu7x:2x2x1
jax: 0.10.0
libtpu: 0.0.40
codegen_flags: <defaults>
</compile_context>

<pallas_src>
import functools

import jax
import jax.numpy as jnp
from jax.experimental import pallas as pl
from jax.experimental.pallas import tpu as pltpu


def _conv2d_kernel(x_ref, w_ref, b_ref, o_ref, *, KH, stride, OH):
    # x_ref: (1, HP, W*Cin)       one batch element, rows zero-padded
    # w_ref: (KH, W*Cin, OW*Cout) banded Toeplitz weights (W-padding folded in)
    # b_ref: (1, OW*Cout)         bias tiled across the OW lane groups
    # o_ref: (1, OH, OW*Cout)     lane-dense output (last dim multiple of 128)
    x = x_ref[0]                                    # (HP, W*Cin)
    wc = x.shape[1]
    acc = jnp.zeros(o_ref.shape[1:], jnp.float32)   # (OH, OW*Cout)

    # Small static tap loop over kh: each iteration is one well-shaped
    # [OH, W*Cin] @ [W*Cin, OW*Cout] MXU matmul (K=64, N=128 here).
    for kh in range(KH):
        if stride == 1:
            slab = jax.lax.slice(x, (kh, 0), (kh + OH, wc))
        else:
            # Note: strided row selection lowers to shuffles; fine for
            # correctness, restructure before heavy stride>1 use.
            slab = jax.lax.slice(
                x, (kh, 0), (kh + stride * (OH - 1) + 1, wc), (stride, 1)
            )
        acc = acc + jnp.dot(slab, w_ref[kh], preferred_element_type=jnp.float32)

    acc = acc + b_ref[...]                          # broadcast (1, OW*Cout)
    o_ref[0] = acc.astype(o_ref.dtype)


def _build_banded_weights(weight_oihw, *, W, OW, stride, padding):
    """B[kh, wi*Cin+ci, ow*Cout+co] = w[co, ci, kh, wi - ow*stride + padding]
    when that kw index is in [0, KW), else 0.  Folds the W-direction taps and
    zero padding into one banded matrix per kh."""
    Cout, Cin, KH, KW = weight_oihw.shape
    w_hwio = jnp.transpose(weight_oihw, (2, 3, 1, 0))          # (KH, KW, Cin, Cout)
    wi = jnp.arange(W)
    ow = jnp.arange(OW)
    kw_idx = wi[:, None] - stride * ow[None, :] + padding      # (W, OW)
    valid = (kw_idx >= 0) & (kw_idx < KW)
    kw_safe = jnp.where(valid, kw_idx, 0)
    b5 = w_hwio[:, kw_safe, :, :]                              # (KH, W, OW, Cin, Cout)
    b5 = jnp.where(valid[None, :, :, None, None], b5, 0.0)
    b5 = jnp.transpose(b5, (0, 1, 3, 2, 4))                    # (KH, W, Cin, OW, Cout)
    return b5.reshape(KH, W * Cin, OW * Cout)


def basic_conv2d(x_nchw, weight_oihw, bias, *, stride, padding):
    """Equivalent of BasicConv2d.forward: y = Conv2d(x) with bias."""
    N, Cin, H, W = x_nchw.shape
    Cout, Cin_w, KH, KW = weight_oihw.shape
    assert Cin == Cin_w

    OH = (H + 2 * padding - KH) // stride + 1
    OW = (W + 2 * padding - KW) // stride + 1
    HP = H + 2 * padding
    WC = W * Cin
    OWC = OW * Cout

    # Glue: layout conversion + row-only zero padding (fused with the
    # NCHW -> channel-last copy).  W padding lives inside the banded weights.
    x2d = jnp.transpose(x_nchw, (0, 2, 3, 1)).reshape(N, H, WC)
    x2d = jnp.pad(x2d, ((0, 0), (padding, padding), (0, 0)))
    w_band = _build_banded_weights(
        weight_oihw, W=W, OW=OW, stride=stride, padding=padding
    )
    b_row = jnp.tile(bias, OW).reshape(1, OWC)

    kernel = functools.partial(_conv2d_kernel, KH=KH, stride=stride, OH=OH)

    out = pl.pallas_call(
        kernel,
        out_shape=jax.ShapeDtypeStruct((N, OH, OWC), x_nchw.dtype),
        grid_spec=pltpu.PrefetchScalarGridSpec(
            num_scalar_prefetch=0,
            grid=(N,),  # one batch element per grid step, sharded across TCs
            in_specs=[
                pl.BlockSpec((1, HP, WC), lambda n: (n, 0, 0)),
                pl.BlockSpec((KH, WC, OWC), lambda n: (0, 0, 0)),
                pl.BlockSpec((1, OWC), lambda n: (0, 0)),
            ],
            out_specs=pl.BlockSpec((1, OH, OWC), lambda n: (n, 0, 0)),
        ),
        compiler_params=pltpu.CompilerParams(
            dimension_semantics=("parallel",),
            vmem_limit_bytes=32 * 1024 * 1024,
        ),
    )(x2d, w_band, b_row)

    out = out.reshape(N, OH, OW, Cout)
    return jnp.transpose(out, (0, 3, 1, 2))  # back to NCHW


if __name__ == "__main__":
    # BasicConv2d(inplanes=4, planes=8, kernel_size=3, stride=1, padding=1)
    inplanes, planes, kernel_size, stride, padding = 4, 8, 3, 1, 1
    N, H, W = 2, 16, 16

    key = jax.random.PRNGKey(0)
    kx, kw, kb = jax.random.split(key, 3)

    x = jax.random.normal(kx, (N, inplanes, H, W), dtype=jnp.float32)
    # Deterministic synthetic parameters (shapes match nn.Conv2d, bias=True).
    weight = jax.random.normal(
        kw, (planes, inplanes, kernel_size, kernel_size), dtype=jnp.float32
    ) * 0.1
    bias = jax.random.normal(kb, (planes,), dtype=jnp.float32) * 0.1

    y = basic_conv2d(x, weight, bias, stride=stride, padding=padding)
    y = jax.block_until_ready(y)

    # Cross-check against XLA's reference convolution.
    y_ref = jax.lax.conv_general_dilated(
        x, weight,
        window_strides=(stride, stride),
        padding=[(padding, padding), (padding, padding)],
        dimension_numbers=("NCHW", "OIHW", "NCHW"),
    ) + bias[None, :, None, None]
    assert y.shape == (N, planes, H, W)
    assert jnp.allclose(y, y_ref, atol=1e-4, rtol=1e-4)

    print("KERNEL_OK")
</pallas_src>

<mosaic_0001>
module attributes {stable_mosaic.version = 11 : i64} {
  func.func @_conv2d_kernel(%arg0: i32, %arg1: memref<1x18x64xf32, #tpu.memory_space<vmem>>, %arg2: memref<3x64x128xf32, #tpu.memory_space<vmem>>, %arg3: memref<1x128xf32, #tpu.memory_space<vmem>>, %arg4: memref<1x16x128xf32, #tpu.memory_space<vmem>>) attributes {dimension_semantics = [#tpu.dimension_semantics<parallel>], iteration_bounds = array<i64: 2>, scalar_prefetch = 0 : i64, scratch_operands = 0 : i64, tpu.core_type = #tpu.core_type<tc>, window_params = [{transform_indices = @transform_0, window_bounds = array<i64: 1, 18, 64>}, {pipeline_mode = #tpu.pipeline_mode<synchronous>, transform_indices = @transform_1, window_bounds = array<i64: 3, 64, 128>}, {pipeline_mode = #tpu.pipeline_mode<synchronous>, transform_indices = @transform_2, window_bounds = array<i64: 1, 128>}, {transform_indices = @transform_3, window_bounds = array<i64: 1, 16, 128>}]} {
    %c0 = arith.constant 0 : index
    %c0_0 = arith.constant 0 : index
    %c0_1 = arith.constant 0 : index
    %0 = vector.load %arg1[%c0, %c0_0, %c0_1] : memref<1x18x64xf32, #tpu.memory_space<vmem>>, vector<1x18x64xf32>
    %1 = vector.shape_cast %0 : vector<1x18x64xf32> to vector<18x64xf32>
    %cst = arith.constant 0.000000e+00 : f32
    %2 = vector.broadcast %cst : f32 to vector<16x128xf32>
    %3 = vector.extract_strided_slice %1 {offsets = [0, 0], sizes = [16, 64], strides = [1, 1]} : vector<18x64xf32> to vector<16x64xf32>
    %c0_2 = arith.constant 0 : index
    %c0_3 = arith.constant 0 : index
    %c0_4 = arith.constant 0 : index
    %4 = vector.load %arg2[%c0_2, %c0_3, %c0_4] : memref<3x64x128xf32, #tpu.memory_space<vmem>>, vector<1x64x128xf32>
    %5 = vector.shape_cast %4 : vector<1x64x128xf32> to vector<64x128xf32>
    %cst_5 = arith.constant dense<0.000000e+00> : vector<16x128xf32>
    %6 = tpu.matmul %3, %5, %cst_5 {dimension_numbers = #tpu.dot_dimension_numbers<[1], [0], [0], [1], [0, 0, 1, 1], [], []>} : vector<16x64xf32>, vector<64x128xf32>, vector<16x128xf32> -> vector<16x128xf32>
    %7 = arith.addf %2, %6 : vector<16x128xf32>
    %8 = vector.extract_strided_slice %1 {offsets = [1, 0], sizes = [16, 64], strides = [1, 1]} : vector<18x64xf32> to vector<16x64xf32>
    %c1 = arith.constant 1 : index
    %c0_6 = arith.constant 0 : index
    %c0_7 = arith.constant 0 : index
    %9 = vector.load %arg2[%c1, %c0_6, %c0_7] : memref<3x64x128xf32, #tpu.memory_space<vmem>>, vector<1x64x128xf32>
    %10 = vector.shape_cast %9 : vector<1x64x128xf32> to vector<64x128xf32>
    %cst_8 = arith.constant dense<0.000000e+00> : vector<16x128xf32>
    %11 = tpu.matmul %8, %10, %cst_8 {dimension_numbers = #tpu.dot_dimension_numbers<[1], [0], [0], [1], [0, 0, 1, 1], [], []>} : vector<16x64xf32>, vector<64x128xf32>, vector<16x128xf32> -> vector<16x128xf32>
    %12 = arith.addf %7, %11 : vector<16x128xf32>
    %13 = vector.extract_strided_slice %1 {offsets = [2, 0], sizes = [16, 64], strides = [1, 1]} : vector<18x64xf32> to vector<16x64xf32>
    %c2 = arith.constant 2 : index
    %c0_9 = arith.constant 0 : index
    %c0_10 = arith.constant 0 : index
    %14 = vector.load %arg2[%c2, %c0_9, %c0_10] : memref<3x64x128xf32, #tpu.memory_space<vmem>>, vector<1x64x128xf32>
    %15 = vector.shape_cast %14 : vector<1x64x128xf32> to vector<64x128xf32>
    %cst_11 = arith.constant dense<0.000000e+00> : vector<16x128xf32>
    %16 = tpu.matmul %13, %15, %cst_11 {dimension_numbers = #tpu.dot_dimension_numbers<[1], [0], [0], [1], [0, 0, 1, 1], [], []>} : vector<16x64xf32>, vector<64x128xf32>, vector<16x128xf32> -> vector<16x128xf32>
    %17 = arith.addf %12, %16 : vector<16x128xf32>
    %c0_12 = arith.constant 0 : index
    %c0_13 = arith.constant 0 : index
    %18 = vector.load %arg3[%c0_12, %c0_13] : memref<1x128xf32, #tpu.memory_space<vmem>>, vector<1x128xf32>
    %19 = vector.broadcast %18 : vector<1x128xf32> to vector<16x128xf32>
    %20 = arith.addf %17, %19 : vector<16x128xf32>
    %c0_14 = arith.constant 0 : index
    %c0_15 = arith.constant 0 : index
    %c0_16 = arith.constant 0 : index
    %21 = vector.load %arg4[%c0_14, %c0_15, %c0_16] : memref<1x16x128xf32, #tpu.memory_space<vmem>>, vector<1x16x128xf32>
    %22 = vector.shape_cast %21 : vector<1x16x128xf32> to vector<16x128xf32>
    %23 = vector.shape_cast %20 : vector<16x128xf32> to vector<1x16x128xf32>
    tpu.vector_store %arg4[%c0_14, %c0_15, %c0_16], %23 {strides = array<i32>} : memref<1x16x128xf32, #tpu.memory_space<vmem>>, vector<1x16x128xf32>,
    return
  }
  func.func @transform_0(%arg0: i32) -> (i32, i32, i32) {
    %c0_i32 = arith.constant 0 : i32
    %c0_i32_0 = arith.constant 0 : i32
    %c0_i32_1 = arith.constant 0 : i32
    return %arg0, %c0_i32, %c0_i32_0 : i32, i32, i32
  }
  func.func @transform_1(%arg0: i32) -> (i32, i32, i32) {
    %c0_i32 = arith.constant 0 : i32
    %c0_i32_0 = arith.constant 0 : i32
    %c0_i32_1 = arith.constant 0 : i32
    %c0_i32_2 = arith.constant 0 : i32
    return %c0_i32, %c0_i32_0, %c0_i32_1 : i32, i32, i32
  }
  func.func @transform_2(%arg0: i32) -> (i32, i32) {
    %c0_i32 = arith.constant 0 : i32
    %c0_i32_0 = arith.constant 0 : i32
    %c0_i32_1 = arith.constant 0 : i32
    return %c0_i32, %c0_i32_0 : i32, i32
  }
  func.func @transform_3(%arg0: i32) -> (i32, i32, i32) {
    %c0_i32 = arith.constant 0 : i32
    %c0_i32_0 = arith.constant 0 : i32
    %c0_i32_1 = arith.constant 0 : i32
    return %arg0, %c0_i32, %c0_i32_0 : i32, i32, i32
  }
}

</mosaic_0001>

<bundles_post_ra>
// kernel: tpu_custom_call.1
= control target key start
LH: loop header
LB: loop body
LE: loop exit
PB: predicated region body
PF: predicated region fallthrough
CT: control target
= control target key end

     0   :  { %8 = vsyncpa [#allocation3], 0  ;;  %s1065_s0 = inlined_call_operand.vmem [shape: f32[2,18,64], index: 0, kind: input, shape index: {}]   ;;  %s1066_s1 = inlined_call_operand.hbm [shape: f32[3,64,128], index: 1, kind: input, shape index: {}]   ;;  %s1067_s2 = inlined_call_operand.vmem [shape: f32[1,128], index: 2, kind: input, shape index: {}]   ;;  %s1068_s3 = inlined_call_operand.hbm [shape: f32[2,16,128], index: 3, kind: output, shape index: {}]  }
   0x1   :  { %9 = vsyncpa [#allocation4], 0 }
   0x2   :  { %11 = vsyncpa [#allocation4 + $0x1], 0  ;;  %s904_s12 = smov 0   ;;  %s906_s13 = smov 0  }
   0x3   :  { %s908_s14 = smov 0   ;;  %s910_s15 = smov 0  }
   0x4 LB: > { %s925_s16 = sadd.s32 4294967295, %s876_s15   ;;  %s567_s17 = sadd.s32 4294967294, %s876_s15   ;;  %s876_s15 = sphi %s910_s15, %s1084_s15   ;;  %s872_s14 = sphi %s908_s14, %s1083_s14   ;;  %s868_s13 = sphi %s906_s13, %s1082_s13   ;;  %s864_s12 = sphi %s904_s12, %s1081_s12  }
   0x5   : > { %s929_s18 = sadd.s32 1, %s876_s15   ;;  %s92_s19 = sadd.s32 1, %s872_s14 }
   0x6   : > { %s89_s20 = ssub.s32 %s876_s15, %s929_s18  ;;  %p102_p0 = scmp.ne.s32.totalorder %s872_s14, %s868_s13 }
   0x7   : > { %p90_p1 = scmp.eq.s32.totalorder %s89_s20, 0  ;;  %p103_p2 = scmp.eq.s32.totalorder %s925_s16, 1 }
   0x8   : > { %p108_p3 = scmp.ne.s32.totalorder %s868_s13, %s864_s12  ;;  %p109_p4 = scmp.eq.s32.totalorder %s567_s17, 1 }
   0x9   : > { %s940_s21 = scalar_select %p90_p1, %s872_s14, %s92_s19  }
   0xa   : > { %p942_p5 = por %p103_p2, %p102_p0  ;;  %p946_p6 = por %p109_p4, %p108_p3 }
   0xb   : > { %p568_p7 = scmp.ge.s32.totalorder %s876_s15, 1  ;;  %p116_p8 = scmp.lt.s32.totalorder %s876_s15, 3 }
   0xc   : > { %s1072_s22 = scalar_select %p942_p5, 1, 0 }
   0xd   : > { %s1073_s23 = scalar_select %p946_p6, 1, 0 }
   0xe   : > { %p1069_p9 = scmp.eq.s32.totalorder %s925_s16, 0  ;;  %p953_p10 = pnand %p568_p7, %p116_p8 }
   0xf   : > { %s878_s25 = smov [#allocation2]   ;;  %s782_s30 = scalar_lea.hbm %s1066_s1, 3072 }
  0x10   : > { %s1074_s24 = scalar_select %p953_p10, 1, 0 }
  0x11   : > { %s128_s26 = sshll.u32 %s878_s25, 4  ;;  %p734_p11 = pneg %p953_p10  ;;  %s129_s26 = int_to_ptr.vmem [resolvable:$true] %s128_s26 }
  0x12   : > { %p783_p13 = scmp.ne.s32.totalorder %s1066_s1, %s782_s30  ;;  %p789_p3 = scmp.lt.u32.totalorder %s782_s30, %s1066_s1 }
  0x13   : > { %p961_p12 = pnand %p1069_p9, %p734_p11 }
  0x15   : > { %p784_p0 = pneg %p961_p12 }
  0x17   : > { %p785_p1 = pnand %p784_p0, %p783_p13 }
  0x19   : > { %p786_p2 = pneg %p785_p1 }
  0x1b   : > { %p791_p4 = pnand %p789_p3, %p786_p2 }
  0x1d   : > { %794 = shalt.err (!%p791_p4)
}
  0x1e   : > { %s795_s8 = scalar_lea.vmem %s129_s26, 3072  ;;  %p803_p9 = scmp.lt.s32.totalorder %s129_s26, %s129_s26 }
  0x1f   : > { %p796_p7 = scmp.ne.s32.totalorder %s129_s26, %s795_s8  ;;  %p804_p6 = scmp.lt.s32.totalorder %s795_s8, %s795_s8 }
  0x21   : > { %p798_p8 = pnand %p796_p7, %p784_p0  ;;  %p805_p5 = por %p804_p6, %p803_p9 }
  0x23   : > { %p799_p11 = pneg %p798_p8 }
  0x25   : > { %p806_p10 = pnand %p805_p5, %p799_p11 }
  0x27   : > { %809 = shalt.err (!%p806_p10)
}
  0x28   : > { %s879_s9 = smov 128   ;;  %s880_s10 = smov 8  }
  0x29   : > { %737 = dma.hbm_to_vmem [thread:$0]  (!%p961_p12), %s1066_s1, 3072, %s129_s26, [#allocation3], %s879_s9, %s879_s9, %s880_s10  }
  0x2a   : > { %p1076_p13 = scmp.ne.s32.totalorder %s1074_s24, 0 }
  0x2b   : > { %p1077_p1 = scmp.eq.s32.totalorder (!%p1076_p13), %s925_s16, 0 }
  0x2c   : > { %155 = sbr.rel (%p1076_p13) target bundleno = 319 (0x13f), region = 32 }
  0x33   : > { %855 = dma.done.wait (%p1077_p1), [#allocation3], 3072   ;;  %p1078_p0 = pmov %p1077_p1 }
  0x34   : > { %p179_p5 = scmp.lt.s32.totalorder %s925_s16, 1  ;;  %v187_v0 = vld [vmem:[#allocation2] sm:$0xff]  ;;  %v188_v1 = vld [vmem:[#allocation2 + $0x8] sm:$0xff]  ;;  %v189_v2 = vld [vmem:[#allocation2 + $0x10] sm:$0xff]  ;;  %vm213_vm0 = vcmask 523264   ;;  %vm207_vm1 = vcmask 1046528  }
  0x35   : > { %857 = vsyncadd (%p1078_p0), [#allocation3], 4294964224  ;;  %v691_v3 = vpack.c.bf16 %v188_v1, %v187_v0  ;;  %v190_v4 = vld [vmem:[#allocation2 + $0x18] sm:$0xff]  ;;  %v191_v6 = vld [vmem:[#allocation2 + $0x20] sm:$0xff]  ;;  %vm381_vm2 = vcmask 1045504   ;;  %s176_s24 = sand.u32 1, %s868_s13  }
  0x36   : > { %s180_s19 = scalar_select %p179_p5, %s925_s16, 1  ;;  %v695_v5 = vpack.c.bf16 %v190_v4, %v189_v2  ;;  %v192_v7 = vld [vmem:[#allocation2 + $0x28] sm:$0xff]  ;;  %v196_v8 = vld [vmem:[#allocation2 + $0x40] sm:$0xff]  ;;  %v193_v15 = vld [vmem:[#allocation2 + $0x30] sm:$0xff] }
  0x37   : > { %692 = vmatprep.subr.bf16.mxu0 %v691_v3  ;;  %v197_v9 = vld [vmem:[#allocation2 + $0x48] sm:$0xff]  ;;  %v699_v14 = vpack.c.bf16 %v192_v7, %v191_v6  ;;  %v198_v16 = vld [vmem:[#allocation2 + $0x50] sm:$0xff]  ;;  %v199_v17 = vld [vmem:[#allocation2 + $0x58] sm:$0xff]  ;;  %s573_s28 = sshll.u32 %s176_s24, 4  ;;  %s587_s6 = sshll.u32 %s925_s16, 8 }
  0x38   : > { %s727_s20 = smul.u32 24, %s180_s19  ;;  %694 = vmatpush3.bf16.msra.mxu0 %v691_v3  ;;  %v675_v11 = vpack.c.bf16 %v197_v9, %v196_v8  ;;  %v194_v19 = vld [vmem:[#allocation2 + $0x38] sm:$0xff]  ;;  %v679_v20 = vpack.c.bf16 %v199_v17, %v198_v16  ;;  %v200_v21 = vld [vmem:[#allocation2 + $0x60] sm:$0xff]  ;;  %v201_v22 = vld [vmem:[#allocation2 + $0x68] sm:$0xff]  ;;  %s178_s4 = scalar_lea.vmem [#allocation5], %s573_s28 }
  0x39   : > { %696 = vmatprep.subr.bf16.mxu0 %v695_v5  ;;  %v683_v24 = vpack.c.bf16 %v201_v22, %v200_v21  ;;  %v703_v25 = vpack.c.bf16 %v194_v19, %v193_v15  ;;  %v202_v26 = vld [vmem:[#allocation2 + $0x70] sm:$0xff]  ;;  %v203_v27 = vld [vmem:[#allocation2 + $0x78] sm:$0xff]  ;;  %v373_v28 = vld [vmem:[#allocation2 + $0x80] sm:$0xff]  ;;  %s493_s5 = sshll.u32 %s178_s4, 4  ;;  %s1022_s9 = scalar_lea.hbm %s1068_s3, %s587_s6  ;;  %s1017_s5 = int_to_ptr.vmem [resolvable:$true] %s493_s5 }
  0x3a   : > { %s992_s26 = scalar_lea.vmem %s1065_s0, %s727_s20  ;;  %676 = vmatprep.subr.bf16.mxu1 %v675_v11  ;;  %v374_v29 = vld [vmem:[#allocation2 + $0x88] sm:$0xff]  ;;  %v687_v31 = vpack.c.bf16 %v203_v27, %v202_v26  ;;  %v375_v35 = vld [vmem:[#allocation2 + $0x90] sm:$0xff]  ;;  %v376_v36 = vld [vmem:[#allocation2 + $0x98] sm:$0xff]  ;;  %s1024_s10 = scalar_lea.sflag [#allocation4], %s176_s24 }
  0x3b   : > { %v184_v10 = vld [vmem:[%s992_s26] sm:$0xff]  ;;  %v997_v13 = vld [vmem:[%s992_s26 + $0x8] sm:$0xff]  ;;  %678 = vmatpush3.bf16.msra.mxu1 %v675_v11  ;;  %v186_v30 = vld [vmem:[%s992_s26 + $0x10] sm:$0x3]  ;;  %v707_v33 = vpack.c.bf16 %v374_v29, %v373_v28  ;;  %v711_v38 = vpack.c.bf16 %v376_v36, %v375_v35  ;;  %s810_s16 = scalar_lea.vmem %s1017_s5, 256  ;;  %p1079_p9 = scmp.ne.s32.totalorder %s1072_s22, 0 }
  0x3c   : > { %v208_v12 = vrot.slane %v184_v10, 1  ;;  %653 = vmatprep.mubr.msk.f32.mxu0 %vm213_vm0, %v184_v10  ;;  %v209_v18 = vrot.slane %v997_v13, 1  ;;  %698 = vmatpush3.bf16.msra.mxu0 %v695_v5  ;;  %v382_v32 = vrot.slane %v184_v10, 2  ;;  %v383_v34 = vrot.slane %v997_v13, 2  ;;  %v377_v40 = vld [vmem:[#allocation2 + $0xa0] sm:$0xff]  ;;  %v378_v41 = vld [vmem:[#allocation2 + $0xa8] sm:$0xff]  ;;  %p811_p6 = scmp.ne.s32.totalorder %s1017_s5, %s810_s16 }
  0x3d   : > { %680 = vmatprep.subr.bf16.mxu1 %v679_v20  ;;  %700 = vmatprep.subr.bf16.mxu0 %v699_v14  ;;  %v211_v37 = vrot.slane %v186_v30, 1  ;;  %v715_v43 = vpack.c.bf16 %v378_v41, %v377_v40  ;;  %v379_v44 = vld [vmem:[#allocation2 + $0xb0] sm:$0xff]  ;;  %v380_v45 = vld [vmem:[#allocation2 + $0xb8] sm:$0xff]  ;;  %v385_v47 = vrot.slane %v186_v30, 2  ;;  %s881_s11 = smov [#allocation5]  }
  0x3e   : > { %v210_v23 = vsel %vm207_vm1, %v208_v12, %v209_v18  ;;  %v384_v39 = vsel %vm381_vm2, %v382_v32, %v383_v34  ;;  %v719_v46 = vpack.c.bf16 %v380_v45, %v379_v44  ;;  %v581_v52 = vld [vmem:[%s1067_s2] ss:$0 sm:$0xff]  ;;  %p812_p10 = pnand %p811_p6, %p1079_p9  ;;  %s814_s17 = sshll.u32 %s881_s11, 4  ;;  %s815_s17 = int_to_ptr.vmem [resolvable:$false] %s814_s17 }
  0x3f   : > { %634 = vmatprep.mubr.msk.f32.mxu1 %vm213_vm0, %v210_v23  ;;  %682 = vmatpush3.bf16.msra.mxu1 %v679_v20  ;;  %v212_v42 = vsel %vm207_vm1, %v209_v18, %v211_v37  ;;  %v386_v48 = vsel %vm381_vm2, %v383_v34, %v385_v47  ;;  %s816_s19 = scalar_lea.vmem %s815_s17, 512  ;;  %p817_p2 = scmp.lt.s32.totalorder %s1017_s5, %s815_s17 }
  0x40   : > { %702 = vmatpush3.bf16.msra.mxu0 %v699_v14  ;;  %684 = vmatprep.subr.bf16.mxu1 %v683_v24  ;;  %p813_p12 = pneg %p812_p10  ;;  %p818_p3 = scmp.lt.s32.totalorder %s816_s19, %s810_s16 }
  0x41   : > { %704 = vmatprep.subr.bf16.mxu0 %v703_v25 }
  0x42   : > { %p819_p4 = por %p818_p3, %p817_p2 }
  0x43   : > { %686 = vmatpush3.bf16.msra.mxu1 %v683_v24 }
  0x44   : > { %706 = vmatpush3.bf16.msra.mxu0 %v703_v25  ;;  %688 = vmatprep.subr.bf16.mxu1 %v687_v31  ;;  %p820_p7 = pnand %p819_p4, %p813_p12 }
  0x45   : > { %708 = vmatprep.subr.bf16.mxu0 %v707_v33 }
  0x47   : > { %654 = vmatmul.mubr.msk.f32.vlgmr.msra.gmra.mrb[0].mxu0 %vm213_vm0, %v997_v13  ;;  %690 = vmatpush3.bf16.msra.mxu1 %v687_v31 }
  0x48   : > { %710 = vmatpush3.bf16.msra.mxu0 %v707_v33  ;;  %672 = vmatprep.mubr.msk.f32.mxu0 %vm213_vm0, %v384_v39 }
  0x49   : > { %712 = vmatprep.subr.bf16.mxu0 %v711_v38 }
  0x4a   : > { %635 = vmatmul.mubr.msk.f32.vlgmr.msra.gmra.mrb[0].mxu1 %vm213_vm0, %v212_v42 }
  0x4c   : > { %714 = vmatpush3.bf16.msra.mxu0 %v711_v38 }
  0x4d   : > { %716 = vmatprep.subr.bf16.mxu0 %v715_v43 }
  0x50   : > { %718 = vmatpush3.bf16.msra.mxu0 %v715_v43 }
  0x51   : > { %720 = vmatprep.subr.bf16.mxu0 %v719_v46 }
  0x54   : > { %722 = vmatpush3.bf16.msra.mxu0 %v719_v46 }
  0x57   : > { %673 = vmatmul.mubr.msk.f32.vlgmr.msra.gmra.mrb[0].mxu0 %vm213_vm0, %v386_v48 }
 0x11d   : > { %v636_v49 = vpop.f32.mrb[0].mxu1 }
 0x11e   : > { %v284_v50 = vpop.f32.mrb[1].mxu1 }
 0x12a   : > { %v674_v51 = vpop.f32.mrb[0].mxu0 }
 0x12b   : > { %v723_v53 = vadd.f32 %v674_v51, %v636_v49  ;;  %v457_v54 = vpop.f32.mrb[1].mxu0 }
 0x12c   : > { %v724_v55 = vadd.f32 %v457_v54, %v284_v50 }
 0x12d   : > { %v476_v56 = vadd.f32 %v723_v53, %v581_v52 }
 0x12e   : > { %v475_v57 = vadd.f32 %v724_v55, %v581_v52 }
 0x12f   : > { %478 = vst [vmem:[%s178_s4 + $0x8] sm:$0xff] %v476_v56 }
 0x130   : > { %477 = vst [vmem:[%s178_s4] sm:$0xff] %v475_v57 }
 0x131   : > { %823 = shalt.err (!%p820_p7)
}
 0x132   : > { %s824_s20 = scalar_lea.hbm %s1022_s9, 256  ;;  %s828_s26 = scalar_lea.hbm %s1068_s3, 512 }
 0x133   : > { %p825_p8 = scmp.ne.s32.totalorder %s1022_s9, %s824_s20  ;;  %p829_p1 = scmp.lt.u32.totalorder %s1022_s9, %s1068_s3 }
 0x134   : > { %p830_p0 = scmp.lt.u32.totalorder %s828_s26, %s824_s20  ;;  %p832_p6 = scmp.lt.u32.totalorder %s824_s20, %s1022_s9 }
 0x135   : > { %p826_p11 = pnand %p825_p8, %p1079_p9 }
 0x136   : > { %p831_p5 = por %p830_p0, %p829_p1 }
 0x137   : > { %p827_p13 = pneg %p826_p11 }
 0x138   : > { %p833_p10 = por %p832_p6, %p831_p5 }
 0x13a   : > { %p834_p12 = pnand %p833_p10, %p827_p13 }
 0x13c   : > { %837 = shalt.err (!%p834_p12)
}
 0x13d   : > { %s882_s29 = smov 128   ;;  %s883_s30 = smov 8  }
 0x13e   : > { %732 = dma.vmem_to_hbm [thread:$0]  (%p1079_p9), %s1017_s5, 256, %s1022_s9, %s1024_s10, %s882_s29, %s882_s29, %s883_s30  }
 0x13f PF: > { %p744_p2 = scmp.ge.s32.totalorder %s876_s15, 2  ;;  %s508_s4 = sand.u32 1, %s864_s12  }
 0x140   : > { %p1080_p3 = scmp.ne.s32.totalorder %s1073_s23, 0  ;;  %s509_s6 = scalar_lea.sflag [#allocation4], %s508_s4 }
 0x142   : > { %p739_p4 = pnand %p744_p2, %p1080_p3 }
 0x144   : > { %859 = dma.done.wait (!%p739_p4), %s509_s6, 256  }
 0x145   : > { %861 = vsyncadd (!%p739_p4), %s509_s6, 4294967040  ;;  %p14_p7 = scmp.ge.s32.totalorder %s929_s18, 4   ;;  %s1081_s12 = smov %s868_s13 }
 0x146   : > { %s1082_s13 = smov %s872_s14  ;;  %s1083_s14 = smov %s940_s21 }
 0x147   : > { %s1084_s15 = smov %s929_s18  ;;  %16 = sbr.rel (!%p14_p7) target bundleno = 4 (0x4), region = 74 }
 0x14e   :  { %514 = vsyncpa [#allocation3], 1 }
 0x14f   :  { %516 = vsyncpa [#allocation3 + $0x1], 1 }
 0x150   :  { %517 = vsyncpa [#allocation4], 1 }
 0x151   :  { %519 = vsyncpa [#allocation4 + $0x1], 1 }

</bundles_post_ra>
